<compile_context>
chip_gen: v7x
topology: tpu7x:2x2x1
jax: 0.10.0
libtpu: 0.0.40
codegen_flags: <defaults>
</compile_context>

<pallas_src>
import functools

import jax
import jax.numpy as jnp
from jax.experimental import pallas as pl
from jax.experimental.pallas import tpu as pltpu


def _round_up(x, m):
    return ((x + m - 1) // m) * m


def _rmsnorm_kernel(x_ref, w_ref, o_ref, *, eps):
    # x_ref: (TM, H) tile; w_ref: (1, H) weight (VMEM-resident: constant index_map).
    x = x_ref[...]
    input_dtype = x.dtype
    xf = x.astype(jnp.float32)
    variance = jnp.mean(xf * xf, axis=-1, keepdims=True)     # (TM, 1) f32
    normed = xf * jax.lax.rsqrt(variance + eps)               # rsqrt -> EUP slot
    # PyTorch semantics: weight * hidden_states.to(input_dtype)
    out = w_ref[...] * normed.astype(input_dtype)
    o_ref[...] = out.astype(o_ref.dtype)


def _vmem_capacity_bytes():
    try:
        return int(pltpu.get_tpu_info().vmem_capacity_bytes)
    except Exception:
        return 64 * 1024 * 1024  # conservative fallback (v7x per-TC VMEM)


def rmsnorm(x, weight, eps=1e-6, *, block_rows=None, out_dtype=None):
    """RMSNorm over the last axis.  x: (..., hidden); weight: (hidden,).

    out_dtype: optional override (e.g. jnp.bfloat16) to avoid writing an f32
    output when activations are bf16; defaults to PyTorch promotion of
    `weight * hidden_states.to(input_dtype)`.
    """
    orig_shape = x.shape
    hidden = int(orig_shape[-1])
    rows = 1
    for d in orig_shape[:-1]:
        rows *= int(d)

    x2d = x.reshape(rows, hidden)
    w2d = weight.reshape(1, hidden)

    if out_dtype is None:
        out_dtype = jnp.promote_types(weight.dtype, x.dtype)

    b_in = jnp.dtype(x.dtype).itemsize
    b_out = jnp.dtype(out_dtype).itemsize
    # Sublane packing: f32 -> 8 rows/vreg, bf16 -> 16, int8/fp8 -> 32.
    sublane_pack = max(8, 32 // b_in)

    vmem_cap = _vmem_capacity_bytes()
    if vmem_cap >= 96 * 1024 * 1024:
        vmem_budget = int(vmem_cap * 0.6)   # v5e / v6e (128 MiB): big tiles
    else:
        vmem_budget = int(vmem_cap * 0.4)   # v7x (64 MiB): leave headroom

    # Per-row VMEM footprint of one grid step:
    #   2x double-buffered input tile + 2x double-buffered output tile
    #   + ~2 tile-sized f32 intermediates (upcast, normalized).
    per_row_bytes = hidden * (2 * b_in + 2 * b_out + 2 * 4)
    row_in_bytes = max(hidden * b_in, 1)

    if block_rows is None:
        tm = vmem_budget // max(per_row_bytes, 1)
        # Tile-bytes cap: ~8 MiB of input per tile keeps per-step overhead <<
        # per-step DMA time on every generation (incl. v7x's faster HBM).
        tm = min(tm, (8 * 1024 * 1024) // row_in_bytes)
        tm = max(tm, sublane_pack)
        tm = (tm // sublane_pack) * sublane_pack
        tm = min(tm, _round_up(rows, sublane_pack))
        # Target ~8 grid steps (3-4 per TensorCore on v7x megacore) so the
        # BlockSpec double-buffer can overlap reads and writebacks, but never
        # shrink a tile below ~512 KiB of input.
        target_steps = 8
        if rows > target_steps * sublane_pack:
            step_cap = _round_up(pl.cdiv(rows, target_steps), sublane_pack)
            min_rows = max(sublane_pack,
                           _round_up((512 * 1024) // row_in_bytes, sublane_pack))
            tm = min(tm, max(step_cap, min_rows))
        tm = max(tm, sublane_pack)
    else:
        tm = max(sublane_pack, (block_rows // sublane_pack) * sublane_pack)

    grid = pl.cdiv(rows, tm)
    # Nudge odd grids to an even step count so both v7x TensorCores get equal
    # work (harmless no-op heuristic on single-TC v5e/v6e).
    if block_rows is None and grid >= 3 and grid % 2 == 1:
        tm2 = max(sublane_pack, _round_up(pl.cdiv(rows, grid + 1), sublane_pack))
        if pl.cdiv(rows, tm2) % 2 == 0:
            tm = tm2
            grid = pl.cdiv(rows, tm)

    # Scoped-VMEM limit: generous but generation-aware (<= 0.75 of capacity:
    # ~48 MiB on v7x, ~96 MiB on v5e/v6e).
    est_bytes = tm * per_row_bytes + 2 * hidden * jnp.dtype(weight.dtype).itemsize
    vmem_limit = min(int(vmem_cap * 0.75),
                     max(16 * 1024 * 1024, int(est_bytes * 1.3) + (1 << 20)))

    kernel = functools.partial(_rmsnorm_kernel, eps=eps)
    out = pl.pallas_call(
        kernel,
        out_shape=jax.ShapeDtypeStruct((rows, hidden), out_dtype),
        grid_spec=pltpu.PrefetchScalarGridSpec(
            num_scalar_prefetch=0,
            grid=(grid,),
            in_specs=[
                pl.BlockSpec((tm, hidden), lambda i: (i, 0)),
                pl.BlockSpec((1, hidden), lambda i: (0, 0)),
            ],
            out_specs=pl.BlockSpec((tm, hidden), lambda i: (i, 0)),
        ),
        compiler_params=pltpu.CompilerParams(
            dimension_semantics=("parallel",),
            vmem_limit_bytes=vmem_limit,
        ),
    )(x2d, w2d)

    return out.reshape(orig_shape)


def rmsnorm_ref(x, weight, eps=1e-6):
    xf = x.astype(jnp.float32)
    variance = jnp.mean(xf * xf, axis=-1, keepdims=True)
    normed = xf * jax.lax.rsqrt(variance + eps)
    return weight * normed.astype(x.dtype)


if __name__ == "__main__":
    key = jax.random.PRNGKey(0)
    k1, k2, k3, k4 = jax.random.split(key, 4)

    def check(out, ref, atol=1e-5, rtol=1e-5):
        assert out.shape == ref.shape, (out.shape, ref.shape)
        assert jnp.allclose(out.astype(jnp.float32), ref.astype(jnp.float32),
                            atol=atol, rtol=rtol), "mismatch vs reference"

    # Case 1: small f32 (batch=2, seq=8, hidden=128), weight = ones (module init).
    x1 = jax.random.normal(k1, (2, 8, 128), dtype=jnp.float32)
    w1 = jnp.ones((128,), dtype=jnp.float32)
    o1 = jax.block_until_ready(rmsnorm(x1, w1))
    assert o1.dtype == rmsnorm_ref(x1, w1).dtype
    check(o1, rmsnorm_ref(x1, w1))

    # Case 2: bf16 activations, f32 weight, odd row count (partial block + promotion).
    x2 = jax.random.normal(k2, (3, 7, 256), dtype=jnp.bfloat16)
    w2 = jnp.ones((256,), dtype=jnp.float32)
    o2 = jax.block_until_ready(rmsnorm(x2, w2))
    assert o2.dtype == rmsnorm_ref(x2, w2).dtype
    check(o2, rmsnorm_ref(x2, w2), atol=2e-2, rtol=2e-2)

    # Case 3: multi-step grid with a ragged last block (rows=130, block_rows=16).
    x3 = jax.random.normal(k3, (2, 65, 128), dtype=jnp.float32)
    w3 = jax.random.normal(k4, (128,), dtype=jnp.float32)
    o3 = jax.block_until_ready(rmsnorm(x3, w3, block_rows=16))
    check(o3, rmsnorm_ref(x3, w3))

    # Case 4: bf16 activations with out_dtype override (fuses the downstream cast).
    o4 = jax.block_until_ready(rmsnorm(x2, w2, out_dtype=jnp.bfloat16))
    assert o4.dtype == jnp.bfloat16
    check(o4, rmsnorm_ref(x2, w2).astype(jnp.bfloat16), atol=3e-2, rtol=3e-2)

    print("KERNEL_OK")
</pallas_src>

<mosaic_0001>
module attributes {stable_mosaic.version = 11 : i64} {
  func.func @_rmsnorm_kernel(%arg0: i32, %arg1: memref<16x128xf32, #tpu.memory_space<vmem>>, %arg2: memref<1x128xf32, #tpu.memory_space<vmem>>, %arg3: memref<16x128xf32, #tpu.memory_space<vmem>>) attributes {dimension_semantics = [#tpu.dimension_semantics<parallel>], iteration_bounds = array<i64: 1>, scalar_prefetch = 0 : i64, scratch_operands = 0 : i64, tpu.core_type = #tpu.core_type<tc>, window_params = [{transform_indices = @transform_0, window_bounds = array<i64: 16, 128>}, {pipeline_mode = #tpu.pipeline_mode<synchronous>, transform_indices = @transform_1, window_bounds = array<i64: 1, 128>}, {transform_indices = @transform_2, window_bounds = array<i64: 16, 128>}]} {
    %c0 = arith.constant 0 : index
    %c0_0 = arith.constant 0 : index
    %0 = vector.load %arg1[%c0, %c0_0] : memref<16x128xf32, #tpu.memory_space<vmem>>, vector<16x128xf32>
    %1 = arith.mulf %0, %0 : vector<16x128xf32>
    %cst = arith.constant dense<0.000000e+00> : vector<16xf32>
    %2 = vector.multi_reduction <add>, %1, %cst [1] : vector<16x128xf32> to vector<16xf32>
    %3 = vector.shape_cast %2 : vector<16xf32> to vector<16x1xf32>
    %cst_1 = arith.constant 1.280000e+02 : f32
    %4 = vector.broadcast %cst_1 : f32 to vector<16x1xf32>
    %5 = arith.divf %3, %4 : vector<16x1xf32>
    %cst_2 = arith.constant 9.99999997E-7 : f32
    %6 = vector.broadcast %cst_2 : f32 to vector<16x1xf32>
    %7 = arith.addf %5, %6 : vector<16x1xf32>
    %8 = math.rsqrt %7 : vector<16x1xf32>
    %9 = vector.broadcast %8 : vector<16x1xf32> to vector<16x128xf32>
    %10 = arith.mulf %0, %9 : vector<16x128xf32>
    %c0_3 = arith.constant 0 : index
    %c0_4 = arith.constant 0 : index
    %11 = vector.load %arg2[%c0_3, %c0_4] : memref<1x128xf32, #tpu.memory_space<vmem>>, vector<1x128xf32>
    %12 = vector.broadcast %11 : vector<1x128xf32> to vector<16x128xf32>
    %13 = arith.mulf %12, %10 : vector<16x128xf32>
    %c0_5 = arith.constant 0 : index
    %c0_6 = arith.constant 0 : index
    %14 = vector.load %arg3[%c0_5, %c0_6] : memref<16x128xf32, #tpu.memory_space<vmem>>, vector<16x128xf32>
    tpu.vector_store %arg3[%c0_5, %c0_6], %13 {strides = array<i32>} : memref<16x128xf32, #tpu.memory_space<vmem>>, vector<16x128xf32>,
    return
  }
  func.func @transform_0(%arg0: i32) -> (i32, i32) {
    %c0_i32 = arith.constant 0 : i32
    %c0_i32_0 = arith.constant 0 : i32
    return %arg0, %c0_i32 : i32, i32
  }
  func.func @transform_1(%arg0: i32) -> (i32, i32) {
    %c0_i32 = arith.constant 0 : i32
    %c0_i32_0 = arith.constant 0 : i32
    %c0_i32_1 = arith.constant 0 : i32
    return %c0_i32, %c0_i32_0 : i32, i32
  }
  func.func @transform_2(%arg0: i32) -> (i32, i32) {
    %c0_i32 = arith.constant 0 : i32
    %c0_i32_0 = arith.constant 0 : i32
    return %arg0, %c0_i32 : i32, i32
  }
}

</mosaic_0001>

<bundles_post_ra>
// kernel: tpu_custom_call.1
= control target key start
LH: loop header
LB: loop body
LE: loop exit
PB: predicated region body
PF: predicated region fallthrough
CT: control target
= control target key end

     0   :  { %7 = vsyncpa [#allocation3], 0  ;;  %s180_s0 = inlined_call_operand.hbm [shape: f32[16,128], index: 0, kind: input, shape index: {}]   ;;  %s181_s1 = inlined_call_operand.vmem [shape: f32[1,128], index: 1, kind: input, shape index: {}]   ;;  %s182_s2 = inlined_call_operand.hbm [shape: f32[16,128], index: 2, kind: output, shape index: {}]  }
   0x1   :  { %8 = vsyncpa [#allocation4], 0  ;;  %s128_s9 = smov [#allocation2]   ;;  %s80_s13 = scalar_lea.hbm %s180_s0, 256 }
   0x2   :  { %s14_s10 = sshll.u32 %s128_s9, 4  ;;  %p81_p0 = scmp.ne.s32.totalorder %s180_s0, %s80_s13  ;;  %s15_s10 = int_to_ptr.vmem [resolvable:$true] %s14_s10 }
   0x3   :  { %p84_p1 = scmp.lt.u32.totalorder %s80_s13, %s180_s0 }
   0x5   :  { %p86_p2 = pnand %p84_p1, %p81_p0 }
   0x7   :  { %89 = shalt.err (!%p86_p2)
}
   0x8   :  { %s90_s18 = scalar_lea.vmem %s15_s10, 256  ;;  %p95_p4 = scmp.lt.s32.totalorder %s15_s10, %s15_s10 }
   0x9   :  { %p91_p3 = scmp.ne.s32.totalorder %s15_s10, %s90_s18  ;;  %p96_p5 = scmp.lt.s32.totalorder %s90_s18, %s90_s18 }
   0xb   :  { %p97_p6 = por %p96_p5, %p95_p4 }
   0xd   :  { %p98_p7 = pnand %p97_p6, %p91_p3 }
   0xf   :  { %101 = shalt.err (!%p98_p7)
}
  0x10   :  { %s129_s19 = smov 128   ;;  %s130_s20 = smov 8  }
  0x11   :  { %20 = dma.hbm_to_vmem [thread:$0]  %s180_s0, 256, %s15_s10, [#allocation3], %s129_s19, %s129_s19, %s130_s20  }
  0x12   :  { %124 = dma.done.wait [#allocation3], 256  }
  0x13   :  { %125 = vsyncadd [#allocation3], 4294967040  ;;  %v26_v0 = vld [vmem:[#allocation2] sm:$0xff]  ;;  %v27_v1 = vld [vmem:[#allocation2 + $0x8] sm:$0xff]  ;;  %s131_s0 = smov [#allocation5]  }
  0x14   :  { %v28_v2 = vmul.f32 %v26_v0, %v26_v0  ;;  %v29_v3 = vmul.f32 %v27_v1, %v27_v1  ;;  %v71_v11 = vld [vmem:[%s181_s1] ss:$0 sm:$0xff]  ;;  %s59_s25 = sshll.u32 %s131_s0, 4  ;;  %s60_s25 = int_to_ptr.vmem [resolvable:$true] %s59_s25 }
  0x15   :  { %s102_s26 = scalar_lea.vmem %s60_s25, 256  ;;  %p107_p9 = scmp.lt.s32.totalorder %s60_s25, %s60_s25 }
  0x16   :  { %30 = vadd.xlane.f32.xlu0 %v28_v2  ;;  %p103_p8 = scmp.ne.s32.totalorder %s60_s25, %s102_s26  ;;  %p108_p10 = scmp.lt.s32.totalorder %s102_s26, %s102_s26 }
  0x18   :  { %p109_p11 = por %p108_p10, %p107_p9 }
  0x1a   :  { %32 = vadd.xlane.f32.xlu0 %v29_v3  ;;  %p110_p12 = pnand %p109_p11, %p103_p8 }
  0xa3   :  { %v31_v4 = vpop.xlane.xlu0 %30 }
  0xa4   :  { %v35_v5 = vmul.f32 0.0078125, %v31_v4 }
  0xa6   :  { %v37_v6 = vadd.f32 1e-06, %v35_v5 }
  0xa7   :  { %v33_v7 = vpop.xlane.xlu0 %32 }
  0xa8   :  { %76 = vrsqrt.f32 %v37_v6  ;;  %v36_v8 = vmul.f32 0.0078125, %v33_v7 }
  0xaa   :  { %v38_v9 = vadd.f32 1e-06, %v36_v8 }
  0xac   :  { %78 = vrsqrt.f32 %v38_v9 }
  0xb2   :  { %v77_v10 = vpop.eup %76 }
  0xb3   :  { %v41_v12 = vmul.f32 %v77_v10, %v26_v0 }
  0xb5   :  { %v50_v13 = vmul.f32 %v71_v11, %v41_v12 }
  0xb6   :  { %v79_v14 = vpop.eup %78 }
  0xb7   :  { %v42_v15 = vmul.f32 %v79_v14, %v27_v1  ;;  %52 = vst [vmem:[#allocation5] sm:$0xff] %v50_v13 }
  0xb9   :  { %v51_v16 = vmul.f32 %v71_v11, %v42_v15 }
  0xbb   :  { %53 = vst [vmem:[#allocation5 + $0x8] sm:$0xff] %v51_v16 }
  0xbc   :  { %113 = shalt.err (!%p110_p12)
}
  0xbd   :  { %s114_s1 = scalar_lea.hbm %s182_s2, 256 }
  0xbe   :  { %p115_p13 = scmp.ne.s32.totalorder %s182_s2, %s114_s1  ;;  %p118_p0 = scmp.lt.u32.totalorder %s114_s1, %s182_s2 }
  0xc0   :  { %p120_p1 = pnand %p118_p0, %p115_p13 }
  0xc2   :  { %123 = shalt.err (!%p120_p1)
}
  0xc3   :  { %65 = dma.vmem_to_hbm [thread:$0]  %s60_s25, 256, %s182_s2, [#allocation4], %s129_s19, %s129_s19, %s130_s20  }
  0xc4   :  { %126 = dma.done.wait [#allocation4], 256  }
  0xc5   :  { %127 = vsyncadd [#allocation4], 4294967040 }
  0xc6   :  { %69 = vsyncpa [#allocation3], 1 }
  0xc7   :  { %70 = vsyncpa [#allocation4], 1 }

</bundles_post_ra>
